<compile_context>
chip_gen: v5e
topology: v5e:2x2
jax: 0.10.0
libtpu: 0.0.40
codegen_flags: <defaults>
</compile_context>

<pallas_src>
import functools

import jax
import jax.numpy as jnp
import numpy as np
from jax.experimental import pallas as pl
from jax.experimental.pallas import tpu as pltpu

LANE = 128
SUBLANE = 8


def _round_up(v, m):
    return -(-v // m) * m


def _pad2(a, rows, cols, dtype=jnp.float32):
    a = jnp.asarray(a, jnp.float32)
    a = jnp.pad(a, ((0, rows - a.shape[0]), (0, cols - a.shape[1])))
    return a.astype(dtype)


# ----------------------------------------------------------------------------
# Fused forward kernel
# ----------------------------------------------------------------------------
def _gcn_fused_kernel(a_ref, x_ref, w1_ref, w2_ref, wfc2_ref,
                      vec_ref, e_ref, demb_ref, o_ref, *, n_valid):
    f32 = jnp.float32
    bf16 = jnp.bfloat16
    n_pad = a_ref.shape[0]
    ch_p = w1_ref.shape[1]
    co_p = w2_ref.shape[1]

    # Row mask: exclude zero-padded node rows from BatchNorm statistics and
    # zero them afterwards so padding never leaks into valid rows.
    rows = jax.lax.broadcasted_iota(jnp.int32, (n_pad, 1), 0)
    mask = (rows < n_valid).astype(f32)
    inv_n = 1.0 / float(n_valid)

    # Packed (1, C) parameter vectors: one DMA, sliced by row here.
    vec = vec_ref[...]
    b1 = vec[0:1, :ch_p]
    b2 = vec[1:2, :co_p]
    bn_g = vec[2:3, :co_p]
    bn_b = vec[3:4, :co_p]
    wfc0 = vec[4:5, :co_p]
    bfc0 = vec[5:6, :co_p]
    be_g = vec[6:7, :co_p]
    be_b = vec[7:8, :co_p]
    bd_g = vec[8:9, :co_p]
    bd_b = vec[9:10, :co_p]
    bfc2 = vec[10:11, :co_p]

    def bdot(p, q):
        # bf16 MXU matmul, f32 accumulation.
        return jnp.dot(p.astype(bf16), q.astype(bf16),
                       preferred_element_type=f32)

    def bn_relu(h, g, b):
        # BatchNorm1d, training-mode batch statistics (eps=1e-5), then ReLU.
        # All statistics / normalization math in f32 (v5e has no bf16 VPU).
        mu = jnp.sum(h * mask, axis=0, keepdims=True) * inv_n
        var = jnp.sum(((h - mu) * mask) ** 2, axis=0, keepdims=True) * inv_n
        hn = (h - mu) * jax.lax.rsqrt(var + 1e-5)
        return jnp.maximum(hn * g + b, 0.0) * mask

    a = a_ref[...]  # bf16 normalized adjacency

    # --- conv1 (reassociated: (A @ X) @ W1 + b1) -> ReLU; dropout(0) = id ---
    ax = bdot(a, x_ref[...])
    h = jnp.maximum(bdot(ax, w1_ref[...]) + b1, 0.0)

    # --- conv2: A @ (H @ W2) + b2 -> BN -> ReLU ---
    h2 = bdot(a, bdot(h, w2_ref[...])) + b2
    h2 = bn_relu(h2, bn_g, bn_b)

    # --- edges branch: Linear(1 -> C) as broadcast mul -> BN -> ReLU ---
    e = e_ref[...] * wfc0 + bfc0
    e = bn_relu(e, be_g, be_b)

    # --- degree branch: embedding rows gathered in the wrapper -> BN -> ReLU ---
    d = bn_relu(demb_ref[...], bd_g, bd_b)

    # --- fc_2: three 128-deep dots summed (no concat temp), lane-dense store ---
    o_ref[...] = (bdot(h2, wfc2_ref[pl.ds(0, co_p), :])
                  + bdot(e, wfc2_ref[pl.ds(co_p, co_p), :])
                  + bdot(d, wfc2_ref[pl.ds(2 * co_p, co_p), :])
                  + bfc2)


# ----------------------------------------------------------------------------
# Adjacency normalization (GCNConv):  A_hat = D^{-1/2} (A + I) D^{-1/2}
# ----------------------------------------------------------------------------
def build_norm_adj(edge_index, edge_weight, n):
    src, dst = edge_index[0], edge_index[1]
    a = jnp.zeros((n, n), jnp.float32).at[dst, src].add(edge_weight)
    a = a + jnp.eye(n, dtype=jnp.float32)
    deg = jnp.sum(a, axis=1)
    dinv = jnp.where(deg > 0, 1.0 / jnp.sqrt(deg), 0.0)
    return a * dinv[:, None] * dinv[None, :]


# ----------------------------------------------------------------------------
# Parameters (weights stored (in, out), i.e. torch weight transposed)
# ----------------------------------------------------------------------------
def init_gcn_params(key, in_channels, hidden_channels, out_channels, vocab=500):
    ks = jax.random.split(key, 5)
    s = 0.1
    return {
        "W1": s * jax.random.normal(ks[0], (in_channels, hidden_channels), jnp.float32),
        "b1": jnp.zeros((1, hidden_channels), jnp.float32),
        "W2": s * jax.random.normal(ks[1], (hidden_channels, out_channels), jnp.float32),
        "b2": jnp.zeros((1, out_channels), jnp.float32),
        "bn_g": jnp.ones((1, out_channels), jnp.float32),
        "bn_b": jnp.zeros((1, out_channels), jnp.float32),
        "W_fc0": s * jax.random.normal(ks[2], (1, out_channels), jnp.float32),
        "b_fc0": jnp.zeros((1, out_channels), jnp.float32),
        "be_g": jnp.ones((1, out_channels), jnp.float32),
        "be_b": jnp.zeros((1, out_channels), jnp.float32),
        "emb": s * jax.random.normal(ks[3], (vocab, out_channels), jnp.float32),
        "bd_g": jnp.ones((1, out_channels), jnp.float32),
        "bd_b": jnp.zeros((1, out_channels), jnp.float32),
        "W_fc2": s * jax.random.normal(ks[4], (3 * out_channels, out_channels), jnp.float32),
        "b_fc2": jnp.zeros((1, out_channels), jnp.float32),
    }


# ----------------------------------------------------------------------------
# Wrapper: pad to lane-dense layout, run the fused kernel, slice padding off
# ----------------------------------------------------------------------------
def gcn_forward(params, x, edge_index, edge_weight, edges, degree):
    n, c_in = x.shape
    c_hid = params["W1"].shape[1]
    c_out = params["W2"].shape[1]

    n_pad = _round_up(n, SUBLANE)
    ci_p = _round_up(c_in, LANE)
    ch_p = _round_up(c_hid, LANE)
    co_p = _round_up(c_out, LANE)
    vec_w = max(ch_p, co_p)

    bf16 = jnp.bfloat16

    # Matmul operands in bf16 (halves DMA bytes, native MXU rate); everything
    # that feeds elementwise BN math stays f32.
    a = build_norm_adj(edge_index, edge_weight, n)
    a_p = _pad2(a, n_pad, n_pad, bf16)
    x_p = _pad2(x, n_pad, ci_p, bf16)
    w1_p = _pad2(params["W1"], ci_p, ch_p, bf16)
    w2_p = _pad2(params["W2"], ch_p, co_p, bf16)
    # W_fc2 rows must line up with the three 128-padded concat blocks.
    blocks = jnp.split(params["W_fc2"], 3, axis=0)
    wfc2_p = jnp.concatenate([_pad2(b, co_p, co_p, bf16) for b in blocks], axis=0)

    # Pack the eleven (1, C) vectors into a single (16, vec_w) f32 input.
    def _row(v):
        v = jnp.asarray(v, jnp.float32).reshape(1, -1)
        return jnp.pad(v, ((0, 0), (0, vec_w - v.shape[1])))

    vec = jnp.concatenate([
        _row(params["b1"]), _row(params["b2"]),
        _row(params["bn_g"]), _row(params["bn_b"]),
        _row(params["W_fc0"]), _row(params["b_fc0"]),
        _row(params["be_g"]), _row(params["be_b"]),
        _row(params["bd_g"]), _row(params["bd_b"]),
        _row(params["b_fc2"]),
    ], axis=0)
    vec_p = jnp.pad(vec, ((0, _round_up(vec.shape[0], SUBLANE) - vec.shape[0]), (0, 0)))

    # Glue inputs.
    e_p = _pad2(edges, n_pad, 1)
    # Embedding gather done here (jnp.take) instead of one-hot @ table in-kernel.
    demb = jnp.take(params["emb"], degree.astype(jnp.int32), axis=0)
    demb_p = _pad2(demb, n_pad, co_p)

    inputs = (a_p, x_p, w1_p, w2_p, wfc2_p, vec_p, e_p, demb_p)

    def _spec(shape):
        nd = len(shape)
        return pl.BlockSpec(shape, lambda i, _nd=nd: (0,) * _nd)

    flops = 2 * (n_pad * n_pad * ci_p          # A @ X
                 + n_pad * ci_p * ch_p         # (AX) @ W1
                 + n_pad * ch_p * co_p         # H @ W2
                 + n_pad * n_pad * co_p        # A @ (HW2)
                 + 3 * n_pad * co_p * co_p)    # fc_2 (three blocks)
    bytes_accessed = int(sum(int(t.size) * t.dtype.itemsize for t in inputs)
                         + n_pad * co_p * 4)
    cost = pl.CostEstimate(flops=int(flops),
                           transcendentals=int(3 * co_p),   # 3x BN rsqrt
                           bytes_accessed=bytes_accessed)

    out = pl.pallas_call(
        functools.partial(_gcn_fused_kernel, n_valid=n),
        grid=(1,),
        in_specs=[_spec(t.shape) for t in inputs],
        out_specs=_spec((n_pad, co_p)),
        out_shape=jax.ShapeDtypeStruct((n_pad, co_p), jnp.float32),
        cost_estimate=cost,
        compiler_params=pltpu.CompilerParams(
            dimension_semantics=("arbitrary",)),
    )(*inputs)
    return out[:n, :c_out]


# ----------------------------------------------------------------------------
# Pure-JAX reference of the same forward.  It uses the SAME precision choices
# (bf16 matmul operands, f32 accumulation, f32 BN) and the same reassociation
# as the kernel so the comparison tolerance can be tight and real numerical
# regressions are caught.
# ----------------------------------------------------------------------------
def gcn_forward_ref(params, x, edge_index, edge_weight, edges, degree):
    a = build_norm_adj(edge_index, edge_weight, x.shape[0])

    def bdot(p, q):
        return jnp.dot(p.astype(jnp.bfloat16), q.astype(jnp.bfloat16),
                       preferred_element_type=jnp.float32)

    def bn_relu(h, g, b):
        mu = jnp.mean(h, axis=0, keepdims=True)
        var = jnp.mean((h - mu) ** 2, axis=0, keepdims=True)
        return jnp.maximum((h - mu) * jax.lax.rsqrt(var + 1e-5) * g + b, 0.0)

    h = jnp.maximum(bdot(bdot(a, x), params["W1"]) + params["b1"], 0.0)
    h = bdot(a, bdot(h, params["W2"])) + params["b2"]
    h = bn_relu(h, params["bn_g"], params["bn_b"])
    e = edges * params["W_fc0"] + params["b_fc0"]
    e = bn_relu(e, params["be_g"], params["be_b"])
    d = jnp.take(params["emb"], degree, axis=0)
    d = bn_relu(d, params["bd_g"], params["bd_b"])
    co = params["W2"].shape[1]
    w = params["W_fc2"]
    return (bdot(h, w[:co]) + bdot(e, w[co:2 * co]) + bdot(d, w[2 * co:])
            + params["b_fc2"])


# ----------------------------------------------------------------------------
if __name__ == "__main__":
    key = jax.random.PRNGKey(0)
    k_x, k_ei, k_ew, k_e, k_d, k_p = jax.random.split(key, 6)

    n_nodes, c_in, c_hid, c_out, n_edges = 16, 8, 32, 16, 40

    x = jax.random.normal(k_x, (n_nodes, c_in), jnp.float32)
    edge_index = jax.random.randint(k_ei, (2, n_edges), 0, n_nodes, jnp.int32)
    edge_weight = jax.random.uniform(k_ew, (n_edges,), jnp.float32)
    edges = jax.random.normal(k_e, (n_nodes, 1), jnp.float32)       # fc_0 input
    degree = jax.random.randint(k_d, (n_nodes,), 0, 20, jnp.int32)  # Embedding(500)

    params = init_gcn_params(k_p, c_in, c_hid, c_out)

    out = gcn_forward(params, x, edge_index, edge_weight, edges, degree)
    jax.block_until_ready(out)
    assert out.shape == (n_nodes, c_out)

    ref = gcn_forward_ref(params, x, edge_index, edge_weight, edges, degree)
    err = float(np.max(np.abs(np.asarray(out) - np.asarray(ref))))
    assert np.allclose(np.asarray(out), np.asarray(ref), atol=2e-3, rtol=2e-3), err

    print("KERNEL_OK")
</pallas_src>

<mosaic_0001>
module attributes {stable_mosaic.version = 11 : i64} {
  func.func @_gcn_fused_kernel(%arg0: i32, %arg1: memref<16x16xbf16, #tpu.memory_space<vmem>>, %arg2: memref<16x128xbf16, #tpu.memory_space<vmem>>, %arg3: memref<128x128xbf16, #tpu.memory_space<vmem>>, %arg4: memref<128x128xbf16, #tpu.memory_space<vmem>>, %arg5: memref<384x128xbf16, #tpu.memory_space<vmem>>, %arg6: memref<16x128xf32, #tpu.memory_space<vmem>>, %arg7: memref<16x1xf32, #tpu.memory_space<vmem>>, %arg8: memref<16x128xf32, #tpu.memory_space<vmem>>, %arg9: memref<16x128xf32, #tpu.memory_space<vmem>>) attributes {dimension_semantics = [#tpu.dimension_semantics<arbitrary>], iteration_bounds = array<i64: 1>, scalar_prefetch = 0 : i64, scratch_operands = 0 : i64, tpu.core_type = #tpu.core_type<tc>, window_params = [{pipeline_mode = #tpu.pipeline_mode<synchronous>, transform_indices = @transform_0, window_bounds = array<i64: 16, 16>}, {pipeline_mode = #tpu.pipeline_mode<synchronous>, transform_indices = @transform_1, window_bounds = array<i64: 16, 128>}, {pipeline_mode = #tpu.pipeline_mode<synchronous>, transform_indices = @transform_2, window_bounds = array<i64: 128, 128>}, {pipeline_mode = #tpu.pipeline_mode<synchronous>, transform_indices = @transform_3, window_bounds = array<i64: 128, 128>}, {pipeline_mode = #tpu.pipeline_mode<synchronous>, transform_indices = @transform_4, window_bounds = array<i64: 384, 128>}, {pipeline_mode = #tpu.pipeline_mode<synchronous>, transform_indices = @transform_5, window_bounds = array<i64: 16, 128>}, {pipeline_mode = #tpu.pipeline_mode<synchronous>, transform_indices = @transform_6, window_bounds = array<i64: 16, 1>}, {pipeline_mode = #tpu.pipeline_mode<synchronous>, transform_indices = @transform_7, window_bounds = array<i64: 16, 128>}, {pipeline_mode = #tpu.pipeline_mode<synchronous>, transform_indices = @transform_8, window_bounds = array<i64: 16, 128>}]} {
    %0 = tpu.iota {dimensions = array<i32: 0>} : vector<16x1xi32>
    %c16_i32 = arith.constant 16 : i32
    %1 = vector.broadcast %c16_i32 : i32 to vector<16x1xi32>
    %2 = arith.cmpi slt, %0, %1 : vector<16x1xi32>
    %3 = arith.extui %2 : vector<16x1xi1> to vector<16x1xi32>
    %4 = arith.sitofp %3 : vector<16x1xi32> to vector<16x1xf32>
    %c0 = arith.constant 0 : index
    %c0_0 = arith.constant 0 : index
    %5 = vector.load %arg6[%c0, %c0_0] : memref<16x128xf32, #tpu.memory_space<vmem>>, vector<16x128xf32>
    %6 = vector.extract_strided_slice %5 {offsets = [0, 0], sizes = [1, 128], strides = [1, 1]} : vector<16x128xf32> to vector<1x128xf32>
    %7 = vector.extract_strided_slice %5 {offsets = [1, 0], sizes = [1, 128], strides = [1, 1]} : vector<16x128xf32> to vector<1x128xf32>
    %8 = vector.extract_strided_slice %5 {offsets = [2, 0], sizes = [1, 128], strides = [1, 1]} : vector<16x128xf32> to vector<1x128xf32>
    %9 = vector.extract_strided_slice %5 {offsets = [3, 0], sizes = [1, 128], strides = [1, 1]} : vector<16x128xf32> to vector<1x128xf32>
    %10 = vector.extract_strided_slice %5 {offsets = [4, 0], sizes = [1, 128], strides = [1, 1]} : vector<16x128xf32> to vector<1x128xf32>
    %11 = vector.extract_strided_slice %5 {offsets = [5, 0], sizes = [1, 128], strides = [1, 1]} : vector<16x128xf32> to vector<1x128xf32>
    %12 = vector.extract_strided_slice %5 {offsets = [6, 0], sizes = [1, 128], strides = [1, 1]} : vector<16x128xf32> to vector<1x128xf32>
    %13 = vector.extract_strided_slice %5 {offsets = [7, 0], sizes = [1, 128], strides = [1, 1]} : vector<16x128xf32> to vector<1x128xf32>
    %14 = vector.extract_strided_slice %5 {offsets = [8, 0], sizes = [1, 128], strides = [1, 1]} : vector<16x128xf32> to vector<1x128xf32>
    %15 = vector.extract_strided_slice %5 {offsets = [9, 0], sizes = [1, 128], strides = [1, 1]} : vector<16x128xf32> to vector<1x128xf32>
    %16 = vector.extract_strided_slice %5 {offsets = [10, 0], sizes = [1, 128], strides = [1, 1]} : vector<16x128xf32> to vector<1x128xf32>
    %c0_1 = arith.constant 0 : index
    %c0_2 = arith.constant 0 : index
    %17 = vector.load %arg1[%c0_1, %c0_2] : memref<16x16xbf16, #tpu.memory_space<vmem>>, vector<16x16xbf16>
    %c0_3 = arith.constant 0 : index
    %c0_4 = arith.constant 0 : index
    %18 = vector.load %arg2[%c0_3, %c0_4] : memref<16x128xbf16, #tpu.memory_space<vmem>>, vector<16x128xbf16>
    %cst = arith.constant dense<0.000000e+00> : vector<16x128xf32>
    %19 = tpu.matmul %17, %18, %cst {dimension_numbers = #tpu.dot_dimension_numbers<[1], [0], [0], [1], [0, 0, 1, 1], [], []>} : vector<16x16xbf16>, vector<16x128xbf16>, vector<16x128xf32> -> vector<16x128xf32>
    %c0_5 = arith.constant 0 : index
    %c0_6 = arith.constant 0 : index
    %20 = vector.load %arg3[%c0_5, %c0_6] : memref<128x128xbf16, #tpu.memory_space<vmem>>, vector<128x128xbf16>
    %21 = arith.truncf %19 : vector<16x128xf32> to vector<16x128xbf16>
    %cst_7 = arith.constant dense<0.000000e+00> : vector<16x128xf32>
    %22 = tpu.matmul %21, %20, %cst_7 {dimension_numbers = #tpu.dot_dimension_numbers<[1], [0], [0], [1], [0, 0, 1, 1], [], []>} : vector<16x128xbf16>, vector<128x128xbf16>, vector<16x128xf32> -> vector<16x128xf32>
    %23 = vector.broadcast %6 : vector<1x128xf32> to vector<16x128xf32>
    %24 = arith.addf %22, %23 : vector<16x128xf32>
    %cst_8 = arith.constant 0.000000e+00 : f32
    %25 = vector.broadcast %cst_8 : f32 to vector<16x128xf32>
    %26 = arith.maximumf %24, %25 : vector<16x128xf32>
    %c0_9 = arith.constant 0 : index
    %c0_10 = arith.constant 0 : index
    %27 = vector.load %arg4[%c0_9, %c0_10] : memref<128x128xbf16, #tpu.memory_space<vmem>>, vector<128x128xbf16>
    %28 = arith.truncf %26 : vector<16x128xf32> to vector<16x128xbf16>
    %cst_11 = arith.constant dense<0.000000e+00> : vector<16x128xf32>
    %29 = tpu.matmul %28, %27, %cst_11 {dimension_numbers = #tpu.dot_dimension_numbers<[1], [0], [0], [1], [0, 0, 1, 1], [], []>} : vector<16x128xbf16>, vector<128x128xbf16>, vector<16x128xf32> -> vector<16x128xf32>
    %30 = arith.truncf %29 : vector<16x128xf32> to vector<16x128xbf16>
    %cst_12 = arith.constant dense<0.000000e+00> : vector<16x128xf32>
    %31 = tpu.matmul %17, %30, %cst_12 {dimension_numbers = #tpu.dot_dimension_numbers<[1], [0], [0], [1], [0, 0, 1, 1], [], []>} : vector<16x16xbf16>, vector<16x128xbf16>, vector<16x128xf32> -> vector<16x128xf32>
    %32 = vector.broadcast %7 : vector<1x128xf32> to vector<16x128xf32>
    %33 = arith.addf %31, %32 : vector<16x128xf32>
    %34 = vector.broadcast %4 : vector<16x1xf32> to vector<16x128xf32>
    %35 = arith.mulf %33, %34 : vector<16x128xf32>
    %cst_13 = arith.constant dense<0.000000e+00> : vector<128xf32>
    %36 = vector.multi_reduction <add>, %35, %cst_13 [0] : vector<16x128xf32> to vector<128xf32>
    %37 = vector.shape_cast %36 : vector<128xf32> to vector<1x128xf32>
    %cst_14 = arith.constant 6.250000e-02 : f32
    %38 = vector.broadcast %cst_14 : f32 to vector<1x128xf32>
    %39 = arith.mulf %37, %38 : vector<1x128xf32>
    %40 = vector.broadcast %39 : vector<1x128xf32> to vector<16x128xf32>
    %41 = arith.subf %33, %40 : vector<16x128xf32>
    %42 = vector.broadcast %4 : vector<16x1xf32> to vector<16x128xf32>
    %43 = arith.mulf %41, %42 : vector<16x128xf32>
    %44 = arith.mulf %43, %43 : vector<16x128xf32>
    %cst_15 = arith.constant dense<0.000000e+00> : vector<128xf32>
    %45 = vector.multi_reduction <add>, %44, %cst_15 [0] : vector<16x128xf32> to vector<128xf32>
    %46 = vector.shape_cast %45 : vector<128xf32> to vector<1x128xf32>
    %cst_16 = arith.constant 6.250000e-02 : f32
    %47 = vector.broadcast %cst_16 : f32 to vector<1x128xf32>
    %48 = arith.mulf %46, %47 : vector<1x128xf32>
    %49 = vector.broadcast %39 : vector<1x128xf32> to vector<16x128xf32>
    %50 = arith.subf %33, %49 : vector<16x128xf32>
    %cst_17 = arith.constant 9.99999974E-6 : f32
    %51 = vector.broadcast %cst_17 : f32 to vector<1x128xf32>
    %52 = arith.addf %48, %51 : vector<1x128xf32>
    %53 = math.rsqrt %52 : vector<1x128xf32>
    %54 = vector.broadcast %53 : vector<1x128xf32> to vector<16x128xf32>
    %55 = arith.mulf %50, %54 : vector<16x128xf32>
    %56 = vector.broadcast %8 : vector<1x128xf32> to vector<16x128xf32>
    %57 = arith.mulf %55, %56 : vector<16x128xf32>
    %58 = vector.broadcast %9 : vector<1x128xf32> to vector<16x128xf32>
    %59 = arith.addf %57, %58 : vector<16x128xf32>
    %cst_18 = arith.constant 0.000000e+00 : f32
    %60 = vector.broadcast %cst_18 : f32 to vector<16x128xf32>
    %61 = arith.maximumf %59, %60 : vector<16x128xf32>
    %62 = vector.broadcast %4 : vector<16x1xf32> to vector<16x128xf32>
    %63 = arith.mulf %61, %62 : vector<16x128xf32>
    %c0_19 = arith.constant 0 : index
    %c0_20 = arith.constant 0 : index
    %64 = vector.load %arg7[%c0_19, %c0_20] : memref<16x1xf32, #tpu.memory_space<vmem>>, vector<16x1xf32>
    %65 = vector.broadcast %64 : vector<16x1xf32> to vector<16x128xf32>
    %66 = vector.broadcast %10 : vector<1x128xf32> to vector<16x128xf32>
    %67 = arith.mulf %65, %66 : vector<16x128xf32>
    %68 = vector.broadcast %11 : vector<1x128xf32> to vector<16x128xf32>
    %69 = arith.addf %67, %68 : vector<16x128xf32>
    %70 = vector.broadcast %4 : vector<16x1xf32> to vector<16x128xf32>
    %71 = arith.mulf %69, %70 : vector<16x128xf32>
    %cst_21 = arith.constant dense<0.000000e+00> : vector<128xf32>
    %72 = vector.multi_reduction <add>, %71, %cst_21 [0] : vector<16x128xf32> to vector<128xf32>
    %73 = vector.shape_cast %72 : vector<128xf32> to vector<1x128xf32>
    %cst_22 = arith.constant 6.250000e-02 : f32
    %74 = vector.broadcast %cst_22 : f32 to vector<1x128xf32>
    %75 = arith.mulf %73, %74 : vector<1x128xf32>
    %76 = vector.broadcast %75 : vector<1x128xf32> to vector<16x128xf32>
    %77 = arith.subf %69, %76 : vector<16x128xf32>
    %78 = vector.broadcast %4 : vector<16x1xf32> to vector<16x128xf32>
    %79 = arith.mulf %77, %78 : vector<16x128xf32>
    %80 = arith.mulf %79, %79 : vector<16x128xf32>
    %cst_23 = arith.constant dense<0.000000e+00> : vector<128xf32>
    %81 = vector.multi_reduction <add>, %80, %cst_23 [0] : vector<16x128xf32> to vector<128xf32>
    %82 = vector.shape_cast %81 : vector<128xf32> to vector<1x128xf32>
    %cst_24 = arith.constant 6.250000e-02 : f32
    %83 = vector.broadcast %cst_24 : f32 to vector<1x128xf32>
    %84 = arith.mulf %82, %83 : vector<1x128xf32>
    %85 = vector.broadcast %75 : vector<1x128xf32> to vector<16x128xf32>
    %86 = arith.subf %69, %85 : vector<16x128xf32>
    %cst_25 = arith.constant 9.99999974E-6 : f32
    %87 = vector.broadcast %cst_25 : f32 to vector<1x128xf32>
    %88 = arith.addf %84, %87 : vector<1x128xf32>
    %89 = math.rsqrt %88 : vector<1x128xf32>
    %90 = vector.broadcast %89 : vector<1x128xf32> to vector<16x128xf32>
    %91 = arith.mulf %86, %90 : vector<16x128xf32>
    %92 = vector.broadcast %12 : vector<1x128xf32> to vector<16x128xf32>
    %93 = arith.mulf %91, %92 : vector<16x128xf32>
    %94 = vector.broadcast %13 : vector<1x128xf32> to vector<16x128xf32>
    %95 = arith.addf %93, %94 : vector<16x128xf32>
    %cst_26 = arith.constant 0.000000e+00 : f32
    %96 = vector.broadcast %cst_26 : f32 to vector<16x128xf32>
    %97 = arith.maximumf %95, %96 : vector<16x128xf32>
    %98 = vector.broadcast %4 : vector<16x1xf32> to vector<16x128xf32>
    %99 = arith.mulf %97, %98 : vector<16x128xf32>
    %c0_27 = arith.constant 0 : index
    %c0_28 = arith.constant 0 : index
    %100 = vector.load %arg8[%c0_27, %c0_28] : memref<16x128xf32, #tpu.memory_space<vmem>>, vector<16x128xf32>
    %101 = vector.broadcast %4 : vector<16x1xf32> to vector<16x128xf32>
    %102 = arith.mulf %100, %101 : vector<16x128xf32>
    %cst_29 = arith.constant dense<0.000000e+00> : vector<128xf32>
    %103 = vector.multi_reduction <add>, %102, %cst_29 [0] : vector<16x128xf32> to vector<128xf32>
    %104 = vector.shape_cast %103 : vector<128xf32> to vector<1x128xf32>
    %cst_30 = arith.constant 6.250000e-02 : f32
    %105 = vector.broadcast %cst_30 : f32 to vector<1x128xf32>
    %106 = arith.mulf %104, %105 : vector<1x128xf32>
    %107 = vector.broadcast %106 : vector<1x128xf32> to vector<16x128xf32>
    %108 = arith.subf %100, %107 : vector<16x128xf32>
    %109 = vector.broadcast %4 : vector<16x1xf32> to vector<16x128xf32>
    %110 = arith.mulf %108, %109 : vector<16x128xf32>
    %111 = arith.mulf %110, %110 : vector<16x128xf32>
    %cst_31 = arith.constant dense<0.000000e+00> : vector<128xf32>
    %112 = vector.multi_reduction <add>, %111, %cst_31 [0] : vector<16x128xf32> to vector<128xf32>
    %113 = vector.shape_cast %112 : vector<128xf32> to vector<1x128xf32>
    %cst_32 = arith.constant 6.250000e-02 : f32
    %114 = vector.broadcast %cst_32 : f32 to vector<1x128xf32>
    %115 = arith.mulf %113, %114 : vector<1x128xf32>
    %116 = vector.broadcast %106 : vector<1x128xf32> to vector<16x128xf32>
    %117 = arith.subf %100, %116 : vector<16x128xf32>
    %cst_33 = arith.constant 9.99999974E-6 : f32
    %118 = vector.broadcast %cst_33 : f32 to vector<1x128xf32>
    %119 = arith.addf %115, %118 : vector<1x128xf32>
    %120 = math.rsqrt %119 : vector<1x128xf32>
    %121 = vector.broadcast %120 : vector<1x128xf32> to vector<16x128xf32>
    %122 = arith.mulf %117, %121 : vector<16x128xf32>
    %123 = vector.broadcast %14 : vector<1x128xf32> to vector<16x128xf32>
    %124 = arith.mulf %122, %123 : vector<16x128xf32>
    %125 = vector.broadcast %15 : vector<1x128xf32> to vector<16x128xf32>
    %126 = arith.addf %124, %125 : vector<16x128xf32>
    %cst_34 = arith.constant 0.000000e+00 : f32
    %127 = vector.broadcast %cst_34 : f32 to vector<16x128xf32>
    %128 = arith.maximumf %126, %127 : vector<16x128xf32>
    %129 = vector.broadcast %4 : vector<16x1xf32> to vector<16x128xf32>
    %130 = arith.mulf %128, %129 : vector<16x128xf32>
    %c0_35 = arith.constant 0 : index
    %c0_36 = arith.constant 0 : index
    %131 = vector.load %arg5[%c0_35, %c0_36] : memref<384x128xbf16, #tpu.memory_space<vmem>>, vector<128x128xbf16>
    %132 = arith.truncf %63 : vector<16x128xf32> to vector<16x128xbf16>
    %cst_37 = arith.constant dense<0.000000e+00> : vector<16x128xf32>
    %133 = tpu.matmul %132, %131, %cst_37 {dimension_numbers = #tpu.dot_dimension_numbers<[1], [0], [0], [1], [0, 0, 1, 1], [], []>} : vector<16x128xbf16>, vector<128x128xbf16>, vector<16x128xf32> -> vector<16x128xf32>
    %c128 = arith.constant 128 : index
    %c0_38 = arith.constant 0 : index
    %134 = vector.load %arg5[%c128, %c0_38] : memref<384x128xbf16, #tpu.memory_space<vmem>>, vector<128x128xbf16>
    %135 = arith.truncf %99 : vector<16x128xf32> to vector<16x128xbf16>
    %cst_39 = arith.constant dense<0.000000e+00> : vector<16x128xf32>
    %136 = tpu.matmul %135, %134, %cst_39 {dimension_numbers = #tpu.dot_dimension_numbers<[1], [0], [0], [1], [0, 0, 1, 1], [], []>} : vector<16x128xbf16>, vector<128x128xbf16>, vector<16x128xf32> -> vector<16x128xf32>
    %137 = arith.addf %133, %136 : vector<16x128xf32>
    %c256 = arith.constant 256 : index
    %c0_40 = arith.constant 0 : index
    %138 = vector.load %arg5[%c256, %c0_40] : memref<384x128xbf16, #tpu.memory_space<vmem>>, vector<128x128xbf16>
    %139 = arith.truncf %130 : vector<16x128xf32> to vector<16x128xbf16>
    %cst_41 = arith.constant dense<0.000000e+00> : vector<16x128xf32>
    %140 = tpu.matmul %139, %138, %cst_41 {dimension_numbers = #tpu.dot_dimension_numbers<[1], [0], [0], [1], [0, 0, 1, 1], [], []>} : vector<16x128xbf16>, vector<128x128xbf16>, vector<16x128xf32> -> vector<16x128xf32>
    %141 = arith.addf %137, %140 : vector<16x128xf32>
    %142 = vector.broadcast %16 : vector<1x128xf32> to vector<16x128xf32>
    %143 = arith.addf %141, %142 : vector<16x128xf32>
    %c0_42 = arith.constant 0 : index
    %c0_43 = arith.constant 0 : index
    %144 = vector.load %arg9[%c0_42, %c0_43] : memref<16x128xf32, #tpu.memory_space<vmem>>, vector<16x128xf32>
    tpu.vector_store %arg9[%c0_42, %c0_43], %143 {strides = array<i32>} : memref<16x128xf32, #tpu.memory_space<vmem>>, vector<16x128xf32>,
    return
  }
  func.func @transform_0(%arg0: i32) -> (i32, i32) {
    %c0_i32 = arith.constant 0 : i32
    %c0_i32_0 = arith.constant 0 : i32
    %c0_i32_1 = arith.constant 0 : i32
    return %c0_i32, %c0_i32_0 : i32, i32
  }
  func.func @transform_1(%arg0: i32) -> (i32, i32) {
    %c0_i32 = arith.constant 0 : i32
    %c0_i32_0 = arith.constant 0 : i32
    %c0_i32_1 = arith.constant 0 : i32
    return %c0_i32, %c0_i32_0 : i32, i32
  }
  func.func @transform_2(%arg0: i32) -> (i32, i32) {
    %c0_i32 = arith.constant 0 : i32
    %c0_i32_0 = arith.constant 0 : i32
    %c0_i32_1 = arith.constant 0 : i32
    return %c0_i32, %c0_i32_0 : i32, i32
  }
  func.func @transform_3(%arg0: i32) -> (i32, i32) {
    %c0_i32 = arith.constant 0 : i32
    %c0_i32_0 = arith.constant 0 : i32
    %c0_i32_1 = arith.constant 0 : i32
    return %c0_i32, %c0_i32_0 : i32, i32
  }
  func.func @transform_4(%arg0: i32) -> (i32, i32) {
    %c0_i32 = arith.constant 0 : i32
    %c0_i32_0 = arith.constant 0 : i32
    %c0_i32_1 = arith.constant 0 : i32
    return %c0_i32, %c0_i32_0 : i32, i32
  }
  func.func @transform_5(%arg0: i32) -> (i32, i32) {
    %c0_i32 = arith.constant 0 : i32
    %c0_i32_0 = arith.constant 0 : i32
    %c0_i32_1 = arith.constant 0 : i32
    return %c0_i32, %c0_i32_0 : i32, i32
  }
  func.func @transform_6(%arg0: i32) -> (i32, i32) {
    %c0_i32 = arith.constant 0 : i32
    %c0_i32_0 = arith.constant 0 : i32
    %c0_i32_1 = arith.constant 0 : i32
    return %c0_i32, %c0_i32_0 : i32, i32
  }
  func.func @transform_7(%arg0: i32) -> (i32, i32) {
    %c0_i32 = arith.constant 0 : i32
    %c0_i32_0 = arith.constant 0 : i32
    %c0_i32_1 = arith.constant 0 : i32
    return %c0_i32, %c0_i32_0 : i32, i32
  }
  func.func @transform_8(%arg0: i32) -> (i32, i32) {
    %c0_i32 = arith.constant 0 : i32
    %c0_i32_0 = arith.constant 0 : i32
    %c0_i32_1 = arith.constant 0 : i32
    return %c0_i32, %c0_i32_0 : i32, i32
  }
}

</mosaic_0001>

<bundles_post_ra>
// kernel: tpu_custom_call.1
= control target key start
LH: loop header
LB: loop body
LE: loop exit
PB: predicated region body
PF: predicated region fallthrough
CT: control target
= control target key end

     0   :  { %13 = vsyncpa [#allocation3], 0  ;;  %s1324_s0 = inlined_call_operand.hbm [shape: bf16[16,16], index: 0, kind: input, shape index: {}]   ;;  %s1325_s1 = inlined_call_operand.hbm [shape: bf16[16,128], index: 1, kind: input, shape index: {}]   ;;  %s1326_s2 = inlined_call_operand.hbm [shape: bf16[128,128], index: 2, kind: input, shape index: {}]   ;;  %s1327_s3 = inlined_call_operand.hbm [shape: bf16[128,128], index: 3, kind: input, shape index: {}]   ;;  %s1328_s4 = inlined_call_operand.hbm [shape: bf16[384,128], index: 4, kind: input, shape index: {}]   ;;  %s1329_s5 = inlined_call_operand.vmem [shape: f32[16,128], index: 5, kind: input, shape index: {}]   ;;  %s1330_s6 = inlined_call_operand.vmem [shape: f32[16,1], index: 6, kind: input, shape index: {}]   ;;  %s1331_s7 = inlined_call_operand.hbm [shape: f32[16,128], index: 7, kind: input, shape index: {}]   ;;  %s1332_s8 = inlined_call_operand.hbm [shape: f32[16,128], index: 8, kind: output, shape index: {}]  }
   0x1   :  { %14 = vsyncpa [#allocation6], 0 }
   0x2   :  { %15 = vsyncpa [#allocation9], 0 }
   0x3   :  { %16 = vsyncpa [#allocation12], 0 }
   0x4   :  { %17 = vsyncpa [#allocation4], 0  ;;  %s35_s29 = sshll.u32 %s1325_s1, 4  ;;  %s1182_s30 = smov [#allocation5]   ;;  %s36_s29 = int_to_ptr.hbm [resolvable:$true] %s35_s29 }
   0x5   :  { %s37_s9 = sshll.u32 %s1182_s30, 4  ;;  %s61_s12 = sshll.u32 %s1327_s3, 4  ;;  %s38_s9 = int_to_ptr.vmem [resolvable:$true] %s37_s9  ;;  %s62_s12 = int_to_ptr.hbm [resolvable:$true] %s61_s12 }
   0x6   :  { %s1183_s13 = smov 64   ;;  %s1184_s14 = smov 4  }
   0x7   :  { %43 = dma.hbm_to_vmem [thread:$0]  %s36_s29, 128, %s38_s9, [#allocation6], %s1183_s13, %s1183_s13, %s1184_s14  }
   0x8   :  { %s1185_s15 = smov [#allocation8]   ;;  %s22_s1 = sshll.u32 %s1324_s0, 4  ;;  %s23_s1 = int_to_ptr.hbm [resolvable:$true] %s22_s1 }
   0x9   :  { %s63_s16 = sshll.u32 %s1185_s15, 4  ;;  %s48_s20 = sshll.u32 %s1326_s2, 4  ;;  %s64_s16 = int_to_ptr.vmem [resolvable:$true] %s63_s16  ;;  %s49_s20 = int_to_ptr.hbm [resolvable:$true] %s48_s20 }
   0xa   :  { %69 = dma.hbm_to_vmem [thread:$0]  %s62_s12, 1024, %s64_s16, [#allocation9], %s1183_s13, %s1183_s13, %s1184_s14  }
   0xb   :  { %s1186_s21 = smov [#allocation2]   ;;  %s1187_s23 = smov [#allocation7]  }
   0xc   :  { %s24_s22 = sshll.u32 %s1186_s21, 4  ;;  %s50_s0 = sshll.u32 %s1187_s23, 4  ;;  %s25_s22 = int_to_ptr.vmem [resolvable:$true] %s24_s22  ;;  %s51_s0 = int_to_ptr.vmem [resolvable:$true] %s50_s0 }
   0xd   :  { %30 = dma.hbm_to_vmem [thread:$0]  %s23_s1, 128, %s25_s22, [#allocation3], %s1183_s13, %s1183_s13, %s1184_s14  }
   0xe   :  { %s74_s26 = sshll.u32 %s1328_s4, 4  ;;  %s91_s28 = sshll.u32 %s1331_s7, 4  ;;  %s75_s26 = int_to_ptr.hbm [resolvable:$true] %s74_s26  ;;  %s92_s28 = int_to_ptr.hbm [resolvable:$true] %s91_s28 }
   0xf   :  { %56 = dma.hbm_to_vmem [thread:$0]  %s49_s20, 1024, %s51_s0, [#allocation6], %s1183_s13, %s1183_s13, %s1184_s14  }
  0x10   :  { %s1188_s29 = smov [#allocation10]   ;;  %s1189_s9 = smov [#allocation11]  }
  0x11   :  { %s76_s30 = sshll.u32 %s1188_s29, 4  ;;  %s93_s4 = sshll.u32 %s1189_s9, 4  ;;  %s77_s30 = int_to_ptr.vmem [resolvable:$true] %s76_s30  ;;  %s94_s4 = int_to_ptr.vmem [resolvable:$true] %s93_s4 }
  0x12   :  { %82 = dma.hbm_to_vmem [thread:$0]  %s75_s26, 3072, %s77_s30, [#allocation9], %s1183_s13, %s1183_s13, %s1184_s14  }
  0x13   :  { %s1190_s10 = smov 128   ;;  %s1191_s11 = smov 8  }
  0x14   :  { %99 = dma.hbm_to_vmem [thread:$0]  %s92_s28, 256, %s94_s4, [#allocation12], %s1190_s10, %s1190_s10, %s1191_s11  }
  0x15   :  { %1172 = dma.done.wait [#allocation3], 128  }
  0x16   :  { %1173 = vsyncadd [#allocation3], 4294967168 }
  0x17   :  { %1174 = dma.done.wait [#allocation6], 1152  }
  0x18   :  { %1175 = vsyncadd [#allocation6], 4294966144 }
  0x19   :  { %1176 = dma.done.wait [#allocation9], 4096  }
  0x1a   :  { %1177 = vsyncadd [#allocation9], 4294963200 }
  0x1b   :  { %1178 = dma.done.wait [#allocation12], 256  }
  0x1c   :  { %1179 = vsyncadd [#allocation12], 4294967040  ;;  %v944_v0 = vld [vmem:[#allocation5] sm:$0xff]  ;;  %v1275_v2 = vld [vmem:[#allocation2] sm:$0xff]  ;;  %vm151_vm0 = vcmask 130048   ;;  %v1192_v22 = vmov 0  }
  0x1d   :  { %v952_v1 = vld [vmem:[#allocation7 + $0x38] sm:$0xff]  ;;  %162 = vmatpush.bf16.msra.mxu0 %v944_v0  ;;  %v951_v3 = vld [vmem:[#allocation7 + $0x30] sm:$0xff]  ;;  %v950_v4 = vld [vmem:[#allocation7 + $0x28] sm:$0xff]  ;;  %997 = vset.pattern.permute.xlu0 %v1192_v22  ;;  %s757_s19 = sshll.u32 %s1332_s8, 4  ;;  %s758_s19 = int_to_ptr.hbm [resolvable:$true] %s757_s19 }
  0x1e   :  { %235 = vmatpush.bf16.msra.mxu1 %v952_v1  ;;  %v949_v5 = vld [vmem:[#allocation7 + $0x20] sm:$0xff]  ;;  %v948_v6 = vld [vmem:[#allocation7 + $0x18] sm:$0xff]  ;;  %v947_v7 = vld [vmem:[#allocation7 + $0x10] sm:$0xff] }
  0x1f   :  { %v946_v8 = vld [vmem:[#allocation7 + $0x8] sm:$0xff]  ;;  %v945_v9 = vld [vmem:[#allocation7] sm:$0xff]  ;;  %v960_v10 = vld [vmem:[#allocation8 + $0x38] sm:$0xff] }
  0x20   :  { %781 = vmatmul.msk.bf16.vlgmr.msra.gmra.mxu0 %vm151_vm0, %v1275_v2  ;;  %316 = vmatpush.bf16.msra.mxu2 %v960_v10  ;;  %v959_v11 = vld [vmem:[#allocation8 + $0x30] sm:$0xff]  ;;  %v958_v12 = vld [vmem:[#allocation8 + $0x28] sm:$0xff]  ;;  %v957_v13 = vld [vmem:[#allocation8 + $0x20] sm:$0xff] }
  0x21   :  { %v956_v17 = vld [vmem:[#allocation8 + $0x18] sm:$0xff]  ;;  %v955_v18 = vld [vmem:[#allocation8 + $0x10] sm:$0xff]  ;;  %v954_v19 = vld [vmem:[#allocation8 + $0x8] sm:$0xff] }
  0x22   :  { %236 = vmatpush.bf16.msra.mxu1 %v951_v3  ;;  %v953_v20 = vld [vmem:[#allocation8] sm:$0xff]  ;;  %v393_v21 = vld [vmem:[%s1330_s6] sm:$0xff]  ;;  %v394_v23 = vld [vmem:[%s1330_s6 + $0x8] sm:$0xff] }
  0x23   :  { %397 = vperm.xlu0 %997, %v393_v21   ;;  %v1288_v24 = vld [vmem:[%s1329_s5] sm:$0xff]  ;;  %v976_v48 = vld [vmem:[#allocation10 + $0x78] sm:$0xff]  ;;  %v974_v51 = vld [vmem:[#allocation10 + $0x68] sm:$0xff] }
  0x24   :  { %317 = vmatpush.bf16.msra.mxu2 %v959_v11  ;;  %v186_v26 = vperm.slane %v1288_v24, 0  ;;  %v405_v34 = vperm.slane %v1288_v24, 4  ;;  %v408_v37 = vperm.slane %v1288_v24, 5  ;;  %589 = vmatpush.bf16.msrb.mxu0 %v976_v48  ;;  %v975_v49 = vld [vmem:[#allocation10 + $0x70] sm:$0xff]  ;;  %v973_v53 = vld [vmem:[#allocation10 + $0x60] sm:$0xff]  ;;  %v972_v55 = vld [vmem:[#allocation10 + $0x58] sm:$0xff] }
  0x26   :  { %237 = vmatpush.bf16.msra.mxu1 %v950_v4 }
  0x28   :  { %318 = vmatpush.bf16.msra.mxu2 %v958_v12  ;;  %590 = vmatpush.bf16.msrb.mxu0 %v975_v49 }
  0x2a   :  { %238 = vmatpush.bf16.msra.mxu1 %v949_v5 }
  0x2b   :  { %402 = vperm.xlu0 %997, %v394_v23   ;;  %v969_v23 = vld [vmem:[#allocation10 + $0x40] sm:$0xff] }
  0x2c   :  { %319 = vmatpush.bf16.msra.mxu2 %v957_v13  ;;  %591 = vmatpush.bf16.msrb.mxu0 %v974_v51  ;;  %v971_v13 = vld [vmem:[#allocation10 + $0x50] sm:$0xff] }
  0x2e   :  { %239 = vmatpush.bf16.msra.mxu1 %v948_v6 }
  0x30   :  { %320 = vmatpush.bf16.msra.mxu2 %v956_v17  ;;  %592 = vmatpush.bf16.msrb.mxu0 %v973_v53  ;;  %v448_v17 = vperm.slane %v1288_v24, 6 }
  0x32   :  { %240 = vmatpush.bf16.msra.mxu1 %v947_v7 }
  0x34   :  { %321 = vmatpush.bf16.msra.mxu2 %v955_v18  ;;  %593 = vmatpush.bf16.msrb.mxu0 %v972_v55  ;;  %v968_v55 = vld [vmem:[#allocation10 + $0x38] sm:$0xff] }
  0x36   :  { %241 = vmatpush.bf16.msra.mxu1 %v946_v8 }
  0x38   :  { %322 = vmatpush.bf16.msra.mxu2 %v954_v19  ;;  %594 = vmatpush.bf16.msrb.mxu0 %v971_v13  ;;  %v964_v13 = vld [vmem:[#allocation10 + $0x18] sm:$0xff] }
  0x3a   :  { %242 = vmatpush.bf16.msra.mxu1 %v945_v9 }
  0x3c   :  { %323 = vmatpush.bf16.msra.mxu2 %v953_v20  ;;  %v451_v20 = vperm.slane %v1288_v24, 7 }
  0x95   :  { %v398_v33 = vpop.permute.xlu0 %397 }
  0x96   :  { %v406_v36 = vmul.f32 %v405_v34, %v398_v33 }
  0x98   :  { %v409_v40 = vadd.f32 %v408_v37, %v406_v36 }
  0x9d   :  { %v164_v14 = vpop.f32.mrf.mxu0  ;;  %v403_v35 = vpop.permute.xlu0 %402 }
  0x9e   :  { %v407_v38 = vmul.f32 %v405_v34, %v403_v35 }
  0xa0   :  { %v410_v41 = vadd.f32 %v408_v37, %v407_v38 }
  0xa2   :  { %v413_v42 = vadd.f32 %v410_v41, %v409_v40 }
  0xa4   :  { %v414_v45 = vrot.slane %v413_v42, 4 }
  0xa5   :  { %v166_v15 = vpop.f32.mrf.mxu0 }
  0xa6   :  { %v185_v16 = vpack.c.bf16 %v166_v15, %v164_v14  ;;  %v415_v46 = vadd.f32 %v414_v45, %v413_v42 }
  0xa8   :  { %243 = vmatmul.bf16.vlgmr.msra.gmra.mxu1 %v185_v16  ;;  %v416_v47 = vrot.slane %v415_v46, 2  ;;  %v970_v16 = vld [vmem:[#allocation10 + $0x48] sm:$0xff] }
  0xa9   :  { %595 = vmatpush.bf16.msrb.mxu0 %v970_v16 }
  0xaa   :  { %v417_v50 = vadd.f32 %v416_v47, %v415_v46  ;;  %v331_v46 = vperm.slane %v1288_v24, 1 }
  0xac   :  { %v418_v52 = vrot.slane %v417_v50, 1 }
  0xad   :  { %596 = vmatpush.bf16.msrb.mxu0 %v969_v23 }
  0xae   :  { %v419_v54 = vadd.f32 %v418_v52, %v417_v50 }
  0xb0   :  { %v420_v56 = vmul.f32 0.0625, %v419_v54 }
  0xb2   :  { %v421_v57 = vsub.f32 %v409_v40, %v420_v56  ;;  %v422_v58 = vsub.f32 %v410_v41, %v420_v56  ;;  %v984_v56 = vld [vmem:[#allocation10 + $0xb8] sm:$0xff] }
  0xb3   :  { %730 = vmatpush.bf16.msrb.mxu1 %v984_v56 }
  0xb4   :  { %v425_v59 = vmul.f32 %v421_v57, %v421_v57  ;;  %v426_v60 = vmul.f32 %v422_v58, %v422_v58 }
  0xb6   :  { %v427_v61 = vadd.f32 %v426_v60, %v425_v59 }
  0xb8   :  { %v428_v62 = vrot.slane %v427_v61, 4 }
  0xba   :  { %v429_v63 = vadd.f32 %v428_v62, %v427_v61  ;;  %v967_v61 = vld [vmem:[#allocation10 + $0x30] sm:$0xff] }
  0xbb   :  { %v983_v62 = vld [vmem:[#allocation10 + $0xb0] sm:$0xff] }
  0xbc   :  { %v430_v0 = vrot.slane %v429_v63, 2  ;;  %731 = vmatpush.bf16.msrb.mxu1 %v983_v62 }
  0xbe   :  { %v431_v1 = vadd.f32 %v430_v0, %v429_v63 }
 0x125   :  { %v244_v25 = vpop.f32.mrf.mxu1 }
 0x126   :  { %v245_v27 = vadd.f32 %v244_v25, %v186_v26 }
 0x128   :  { %v249_v30 = vmax.f32 %v245_v27, 0.0  ;;  %v458_v27 = vld [vmem:[#allocation11] sm:$0xff] }
 0x12d   :  { %v246_v28 = vpop.f32.mrf.mxu1 }
 0x12e   :  { %v247_v29 = vadd.f32 %v246_v28, %v186_v26  ;;  %v459_v28 = vld [vmem:[#allocation11 + $0x8] sm:$0xff] }
 0x130   :  { %v250_v31 = vmax.f32 %v247_v29, 0.0 }
 0x132   :  { %v267_v32 = vpack.c.bf16 %v250_v31, %v249_v30  ;;  %v462_v30 = vadd.f32 %v459_v28, %v458_v27 }
 0x134   :  { %324 = vmatmul.bf16.vlgmr.msra.gmra.mxu2 %v267_v32  ;;  %v463_v31 = vrot.slane %v462_v30, 4 }
 0x136   :  { %v464_v32 = vadd.f32 %v463_v31, %v462_v30  ;;  %v962_v30 = vld [vmem:[#allocation10 + $0x8] sm:$0xff] }
 0x137   :  { %v978_v31 = vld [vmem:[#allocation10 + $0x88] sm:$0xff] }
 0x138   :  { %v465_v33 = vrot.slane %v464_v32, 2 }
 0x13a   :  { %v466_v34 = vadd.f32 %v465_v33, %v464_v32 }
 0x13c   :  { %v467_v35 = vrot.slane %v466_v34, 1 }
 0x13e   :  { %v468_v36 = vadd.f32 %v467_v35, %v466_v34  ;;  %v961_v35 = vld [vmem:[#allocation10] sm:$0xff] }
 0x140   :  { %v469_v37 = vmul.f32 0.0625, %v468_v36  ;;  %v977_v36 = vld [vmem:[#allocation10 + $0x80] sm:$0xff] }
 0x142   :  { %v1297_v38 = vsub.f32 %v458_v27, %v469_v37 }
 0x144   :  { %v474_v40 = vmul.f32 %v1297_v38, %v1297_v38 }
 0x1b7   :  { %v325_v39 = vpop.f32.mrf.mxu2 }
 0x1bf   :  { %v327_v43 = vpop.f32.mrf.mxu2 }
 0x1c0   :  { %v330_v44 = vpack.c.bf16 %v327_v43, %v325_v39  ;;  %v1299_v39 = vsub.f32 %v459_v28, %v469_v37 }
 0x1c2   :  { %339 = vmatpush.bf16.msra.mxu3 %v330_v44  ;;  %v475_v41 = vmul.f32 %v1299_v39, %v1299_v39 }
 0x1c4   :  { %v476_v42 = vadd.f32 %v475_v41, %v474_v40 }
 0x1c5   :  { %846 = vmatmul.msk.bf16.vlgmr.msra.gmra.mxu3 %vm151_vm0, %v1275_v2  ;;  %v432_v2 = vrot.slane %v431_v1, 1 }
 0x1c6   :  { %v477_v44 = vrot.slane %v476_v42, 4  ;;  %651 = vmatpush.bf16.msrb.mxu3 %v968_v55  ;;  %v383_v55 = vperm.slane %v1288_v24, 2 }
 0x1c7   :  { %v433_v3 = vadd.f32 %v432_v2, %v431_v1  ;;  %v966_v1 = vld [vmem:[#allocation10 + $0x28] sm:$0xff] }
 0x1c8   :  { %v478_v45 = vadd.f32 %v477_v44, %v476_v42  ;;  %v982_v2 = vld [vmem:[#allocation10 + $0xa8] sm:$0xff] }
 0x1c9   :  { %v434_v4 = vmul.f32 0.0625, %v433_v3  ;;  %732 = vmatpush.bf16.msrb.mxu1 %v982_v2 }
 0x1ca   :  { %v479_v47 = vrot.slane %v478_v45, 2  ;;  %652 = vmatpush.bf16.msrb.mxu3 %v967_v61 }
 0x1cb   :  { %v435_v5 = vadd.f32 1e-05, %v434_v4 }
 0x1cc   :  { %v480_v48 = vadd.f32 %v479_v47, %v478_v45 }
 0x1cd   :  { %998 = vrsqrt.f32 %v435_v5  ;;  %vm442_vm1 = vweird.f32 %v435_v5 }
 0x1ce   :  { %v481_v52 = vrot.slane %v480_v48, 1  ;;  %653 = vmatpush.bf16.msrb.mxu3 %v966_v1 }
 0x1d0   :  { %v482_v54 = vadd.f32 %v481_v52, %v480_v48 }
 0x1d3   :  { %v999_v6 = vpop.eup %998 }
 0x1d4   :  { %v437_v7 = vmul.f32 %v999_v6, %v435_v5  ;;  %vm443_vm2 = vweird.f32 %v999_v6 }
 0x1d5   :  { %vm444_vm3 = vmor %vm442_vm1, %vm443_vm2 }
 0x1d6   :  { %v438_v8 = vmul.f32 %v999_v6, %v437_v7  ;;  %v981_v7 = vld [vmem:[#allocation10 + $0xa0] sm:$0xff] }
 0x1d7   :  { %733 = vmatpush.bf16.msrb.mxu1 %v981_v7 }
 0x1d8   :  { %v439_v9 = vmul.f32 0.5, %v438_v8 }
 0x1da   :  { %v440_v10 = vsub.f32 1.5, %v439_v9 }
 0x1dc   :  { %v441_v11 = vmul.f32 %v999_v6, %v440_v10 }
 0x1de   :  { %v445_v12 = vsel %vm444_vm3, %v999_v6, %v441_v11  ;;  %v965_v6 = vld [vmem:[#allocation10 + $0x20] sm:$0xff] }
 0x1df   :  { %v446_v14 = vmul.f32 %v445_v12, %v421_v57  ;;  %v447_v15 = vmul.f32 %v445_v12, %v422_v58  ;;  %v483_v58 = vmul.f32 0.0625, %v482_v54  ;;  %654 = vmatpush.bf16.msrb.mxu3 %v965_v6 }
 0x1e1   :  { %v449_v18 = vmul.f32 %v448_v17, %v446_v14  ;;  %v450_v19 = vmul.f32 %v448_v17, %v447_v15  ;;  %v484_v60 = vadd.f32 1e-05, %v483_v58  ;;  %v980_v14 = vld [vmem:[#allocation10 + $0x98] sm:$0xff] }
 0x1e2   :  { %734 = vmatpush.bf16.msrb.mxu1 %v980_v14 }
 0x1e3   :  { %v452_v21 = vadd.f32 %v451_v20, %v449_v18  ;;  %v453_v22 = vadd.f32 %v451_v20, %v450_v19  ;;  %1000 = vrsqrt.f32 %v484_v60  ;;  %655 = vmatpush.bf16.msrb.mxu3 %v964_v13  ;;  %v963_v20 = vld [vmem:[#allocation10 + $0x10] sm:$0xff]  ;;  %vm491_vm4 = vweird.f32 %v484_v60 }
 0x1e5   :  { %v454_v25 = vmax.f32 %v452_v21, 0.0  ;;  %v455_v26 = vmax.f32 %v453_v22, 0.0  ;;  %v979_v21 = vld [vmem:[#allocation10 + $0x90] sm:$0xff] }
 0x1e6   :  { %735 = vmatpush.bf16.msrb.mxu1 %v979_v21 }
 0x1e7   :  { %v540_v29 = vpack.c.bf16 %v455_v26, %v454_v25  ;;  %656 = vmatpush.bf16.msrb.mxu3 %v963_v20  ;;  %v1309_v25 = vld [vmem:[%s1329_s5 + $0x8] sm:$0xff]  ;;  %s1193_s5 = smov [#allocation13]  }
 0x1e8   :  { %v497_v32 = vperm.slane %v1309_v25, 0  ;;  %v500_v34 = vperm.slane %v1309_v25, 1  ;;  %v746_v7 = vperm.slane %v1309_v25, 2  ;;  %s755_s18 = sshll.u32 %s1193_s5, 4  ;;  %s756_s18 = int_to_ptr.vmem [resolvable:$true] %s755_s18 }
 0x1e9   :  { %597 = vmatmul.bf16.vlgmr.msrb.gmra.mxu0 %v540_v29  ;;  %v1001_v4 = vpop.eup %1000 }
 0x1ea   :  { %v486_v8 = vmul.f32 %v1001_v4, %v484_v60  ;;  %vm492_vm5 = vweird.f32 %v1001_v4  ;;  %736 = vmatpush.bf16.msrb.mxu1 %v978_v31 }
 0x1eb   :  { %vm493_vm6 = vmor %vm491_vm4, %vm492_vm5  ;;  %657 = vmatpush.bf16.msrb.mxu3 %v962_v30 }
 0x1ec   :  { %v487_v10 = vmul.f32 %v1001_v4, %v486_v8 }
 0x1ee   :  { %v488_v15 = vmul.f32 0.5, %v487_v10  ;;  %737 = vmatpush.bf16.msrb.mxu1 %v977_v36 }
 0x1ef   :  { %658 = vmatpush.bf16.msrb.mxu3 %v961_v35 }
 0x1f0   :  { %v489_v18 = vsub.f32 1.5, %v488_v15 }
 0x1f2   :  { %v490_v22 = vmul.f32 %v1001_v4, %v489_v18 }
 0x1f4   :  { %v494_v26 = vsel %vm493_vm6, %v1001_v4, %v490_v22 }
 0x1f5   :  { %v495_v28 = vmul.f32 %v494_v26, %v1297_v38  ;;  %v496_v29 = vmul.f32 %v494_v26, %v1299_v39 }
 0x1f7   :  { %v498_v37 = vmul.f32 %v497_v32, %v495_v28  ;;  %v499_v40 = vmul.f32 %v497_v32, %v496_v29 }
 0x1f9   :  { %v501_v42 = vadd.f32 %v500_v34, %v498_v37 }
 0x1fb   :  { %v503_v38 = vmax.f32 %v501_v42, 0.0 }
 0x248   :  { %v341_v43 = vpop.f32.mrf.mxu3 }
 0x249   :  { %v342_v50 = vadd.f32 %v341_v43, %v331_v46  ;;  %v502_v43 = vadd.f32 %v500_v34, %v499_v40 }
 0x24b   :  { %v504_v39 = vmax.f32 %v502_v43, 0.0 }
 0x250   :  { %v343_v49 = vpop.f32.mrf.mxu3 }
 0x251   :  { %v344_v51 = vadd.f32 %v343_v49, %v331_v46  ;;  %v681_v46 = vpack.c.bf16 %v504_v39, %v503_v38 }
 0x253   :  { %v348_v53 = vadd.f32 %v344_v51, %v342_v50  ;;  %738 = vmatmul.bf16.vlgmr.msrb.gmra.mxu1 %v681_v46 }
 0x255   :  { %v349_v57 = vrot.slane %v348_v53, 4 }
 0x257   :  { %v350_v59 = vadd.f32 %v349_v57, %v348_v53 }
 0x259   :  { %v351_v63 = vrot.slane %v350_v59, 2 }
 0x25b   :  { %v352_v0 = vadd.f32 %v351_v63, %v350_v59  ;;  %v386_v59 = vperm.slane %v1288_v24, 3 }
 0x25d   :  { %v353_v3 = vrot.slane %v352_v0, 1 }
 0x25f   :  { %v354_v5 = vadd.f32 %v353_v3, %v352_v0 }
 0x261   :  { %v355_v9 = vmul.f32 0.0625, %v354_v5 }
 0x263   :  { %v356_v11 = vsub.f32 %v342_v50, %v355_v9  ;;  %v357_v12 = vsub.f32 %v344_v51, %v355_v9 }
 0x265   :  { %v360_v16 = vmul.f32 %v356_v11, %v356_v11  ;;  %v361_v17 = vmul.f32 %v357_v12, %v357_v12 }
 0x266   :  { %v598_v3 = vpop.f32.mrf.mxu0 }
 0x267   :  { %v362_v19 = vadd.f32 %v361_v17, %v360_v16 }
 0x269   :  { %v363_v23 = vrot.slane %v362_v19, 4 }
 0x26b   :  { %v364_v27 = vadd.f32 %v363_v23, %v362_v19 }
 0x26d   :  { %v365_v33 = vrot.slane %v364_v27, 2 }
 0x26e   :  { %v600_v10 = vpop.f32.mrf.mxu0 }
 0x26f   :  { %v366_v41 = vadd.f32 %v365_v33, %v364_v27 }
 0x271   :  { %v367_v44 = vrot.slane %v366_v41, 1 }
 0x273   :  { %v368_v45 = vadd.f32 %v367_v44, %v366_v41 }
 0x275   :  { %v369_v47 = vmul.f32 0.0625, %v368_v45 }
 0x277   :  { %v370_v48 = vadd.f32 1e-05, %v369_v47 }
 0x279   :  { %1002 = vrsqrt.f32 %v370_v48  ;;  %vm377_vm8 = vweird.f32 %v370_v48 }
 0x27f   :  { %v1003_v49 = vpop.eup %1002 }
 0x280   :  { %v372_v50 = vmul.f32 %v1003_v49, %v370_v48  ;;  %vm378_vm7 = vweird.f32 %v1003_v49 }
 0x281   :  { %vm379_vm9 = vmor %vm377_vm8, %vm378_vm7 }
 0x282   :  { %v373_v51 = vmul.f32 %v1003_v49, %v372_v50 }
 0x284   :  { %v374_v52 = vmul.f32 0.5, %v373_v51 }
 0x286   :  { %v375_v53 = vsub.f32 1.5, %v374_v52 }
 0x288   :  { %v376_v54 = vmul.f32 %v1003_v49, %v375_v53 }
 0x28a   :  { %v380_v56 = vsel %vm379_vm9, %v1003_v49, %v376_v54 }
 0x28b   :  { %v381_v57 = vmul.f32 %v380_v56, %v356_v11  ;;  %v382_v58 = vmul.f32 %v380_v56, %v357_v12 }
 0x28d   :  { %v385_v60 = vmul.f32 %v383_v55, %v382_v58  ;;  %v384_v61 = vmul.f32 %v383_v55, %v381_v57 }
 0x28f   :  { %v387_v62 = vadd.f32 %v386_v59, %v384_v61  ;;  %v388_v63 = vadd.f32 %v386_v59, %v385_v60 }
 0x291   :  { %v389_v0 = vmax.f32 %v387_v62, 0.0  ;;  %v390_v1 = vmax.f32 %v388_v63, 0.0 }
 0x293   :  { %v523_v2 = vpack.c.bf16 %v390_v1, %v389_v0 }
 0x295   :  { %659 = vmatmul.bf16.vlgmr.msrb.gmra.mxu3 %v523_v2 }
 0x2d0   :  { %v739_v4 = vpop.f32.mrf.mxu1 }
 0x2d8   :  { %v741_v12 = vpop.f32.mrf.mxu1 }
 0x318   :  { %v660_v5 = vpop.f32.mrf.mxu3 }
 0x319   :  { %v661_v6 = vadd.f32 %v660_v5, %v598_v3 }
 0x31b   :  { %v744_v8 = vadd.f32 %v739_v4, %v661_v6 }
 0x31d   :  { %v747_v9 = vadd.f32 %v746_v7, %v744_v8 }
 0x31f   :  { %749 = vst [vmem:[#allocation13] sm:$0xff] %v747_v9 }
 0x320   :  { %v662_v11 = vpop.f32.mrf.mxu3 }
 0x321   :  { %v663_v24 = vadd.f32 %v662_v11, %v600_v10 }
 0x323   :  { %v745_v13 = vadd.f32 %v741_v12, %v663_v24 }
 0x325   :  { %v748_v14 = vadd.f32 %v746_v7, %v745_v13 }
 0x327   :  { %750 = vst [vmem:[#allocation13 + $0x8] sm:$0xff] %v748_v14 }
 0x328   :  { %763 = dma.vmem_to_hbm [thread:$0]  %s756_s18, 256, %s758_s19, [#allocation4], %s1190_s10, %s1190_s10, %s1191_s11  }
 0x329   :  { %1180 = dma.done.wait [#allocation4], 256  }
 0x32a   :  { %1181 = vsyncadd [#allocation4], 4294967040 }
 0x32b   :  { %768 = vsyncpa [#allocation3], 1 }
 0x32c   :  { %769 = vsyncpa [#allocation6], 1 }
 0x32d   :  { %770 = vsyncpa [#allocation9], 1 }
 0x32e   :  { %771 = vsyncpa [#allocation12], 1 }
 0x32f   :  { %772 = vsyncpa [#allocation4], 1 }

</bundles_post_ra>
